<compile_context>
chip_gen: v7x
topology: tpu7x:2x2x1
jax: 0.10.0
libtpu: 0.0.40
codegen_flags: <defaults>
</compile_context>

<pallas_src>
import functools

import jax
import jax.numpy as jnp
from jax import lax
from jax.experimental import pallas as pl
from jax.experimental.pallas import tpu as pltpu

LANE = 128      # lane (last-dim) granularity
SUBLANE = 8     # f32 sublane granularity


def _round_up(x, m):
    return (x + m - 1) // m * m


def _vmem_capacity_bytes():
    """Physical VMEM per TensorCore (generation aware; conservative fallback)."""
    try:
        return int(pltpu.get_tpu_info().vmem_capacity_bytes)
    except Exception:
        return 64 * 1024 * 1024   # v7x is the smallest (64 MiB) -> safe default


def mlp_kernel(counts_ref, wet_ref, w0t_ref, w1t_ref, wut_ref, *rest,
               masked_vocab):
    """One batch tile: log_softmax(relu(relu((counts@WEt) @ W0t) @ W1t) @ WUt)."""
    if masked_vocab:
        bias_ref, out_ref = rest
    else:
        (out_ref,) = rest

    # Embedding gather + position sum == counts @ WEt.  The positional sum is
    # unweighted, so this is exact; use HIGHEST precision so the fused matmul
    # matches the f32 reference gather+sum.
    counts = counts_ref[...]                                          # (Bt, Vp)
    x = jnp.dot(counts, wet_ref[...],
                precision=lax.Precision.HIGHEST,
                preferred_element_type=jnp.float32)                   # (Bt, Dp)

    h0 = jnp.maximum(
        jnp.dot(x.astype(w0t_ref.dtype), w0t_ref[...],
                preferred_element_type=jnp.float32), 0.0)             # (Bt, Hp)
    h1 = jnp.maximum(
        jnp.dot(h0.astype(w1t_ref.dtype), w1t_ref[...],
                preferred_element_type=jnp.float32), 0.0)             # (Bt, Dp)
    logits = jnp.dot(h1.astype(wut_ref.dtype), wut_ref[...],
                     preferred_element_type=jnp.float32)              # (Bt, Vp)

    if masked_vocab:
        # (1, Vp) additive bias: 0 on real vocab lanes, -inf on padded lanes,
        # so padded lanes never perturb the normalization.
        logits = logits + bias_ref[...]

    # Numerically-stable log_softmax over the (lane) vocab axis.
    m = jnp.max(logits, axis=-1, keepdims=True)
    s = logits - m
    lse = jnp.log(jnp.sum(jnp.exp(s), axis=-1, keepdims=True))
    out_ref[...] = (s - lse).astype(out_ref.dtype)


def prepare_params(W_E, W0, W1, WU, weight_dtype=jnp.float32):
    """Pre-transpose and lane-pad the weights ONCE (reused every forward)."""
    d_model, d_vocab = W_E.shape
    Dp = _round_up(d_model, LANE)
    Hp = _round_up(2 * d_model, LANE)
    Vp = _round_up(d_vocab, LANE)

    # Embedding table as rows indexed by token id.  Kept in f32 so the fused
    # counts @ WEt position-sum stays exact.
    WEt = jnp.zeros((Vp, Dp), jnp.float32).at[:d_vocab, :d_model].set(W_E.T)
    # Pre-transposed matmul weights (zero padding keeps the math exact).
    W0t = jnp.zeros((Dp, Hp), weight_dtype).at[:d_model, :2 * d_model].set(
        W0.T.astype(weight_dtype))
    W1t = jnp.zeros((Hp, Dp), weight_dtype).at[:2 * d_model, :d_model].set(
        W1.T.astype(weight_dtype))
    WUt = jnp.zeros((Dp, Vp), weight_dtype).at[:d_model, :d_vocab].set(
        WU.T.astype(weight_dtype))

    # Additive 0/-inf vocab mask; only needed when the vocab is lane-padded.
    if Vp != d_vocab:
        vocab_bias = jnp.where(jnp.arange(Vp) < d_vocab, 0.0,
                               -jnp.inf).astype(jnp.float32)[None, :]
    else:
        vocab_bias = None

    return dict(WEt=WEt, W0t=W0t, W1t=W1t, WUt=WUt, vocab_bias=vocab_bias,
                d_model=d_model, d_vocab=d_vocab, Dp=Dp, Hp=Hp, Vp=Vp)


def mlp_forward(tokens, params, *, batch_tile=256, out_dtype=jnp.float32):
    """tokens: (B, P) int32; params: output of prepare_params."""
    WEt, W0t, W1t, WUt = params["WEt"], params["W0t"], params["W1t"], params["WUt"]
    vocab_bias = params["vocab_bias"]
    d_vocab = params["d_vocab"]
    Dp, Hp, Vp = params["Dp"], params["Hp"], params["Vp"]
    B, P = tokens.shape
    masked_vocab = vocab_bias is not None

    # Token-count matrix: the kernel fuses the embedding gather + position sum
    # as x = counts @ WEt (exact, since the positional sum is unweighted).
    counts = jnp.zeros((B, Vp), jnp.float32).at[
        jnp.arange(B)[:, None], tokens].add(1.0)

    # Resident (single-buffered) weight footprint.
    weights = [WEt, W0t, W1t, WUt] + ([vocab_bias] if masked_vocab else [])
    weight_bytes = sum(int(a.size) * a.dtype.itemsize for a in weights)
    out_itemsize = jnp.dtype(out_dtype).itemsize
    # Per-batch-row activation bytes: double-buffered counts in + output out.
    act_row_bytes = 2 * Vp * 4 + 2 * Vp * out_itemsize

    vmem_cap = _vmem_capacity_bytes()
    vmem_budget = int(0.85 * vmem_cap)

    # Largest sublane-aligned batch tile that fits the activation budget.
    Bt = max(SUBLANE, _round_up(min(batch_tile, _round_up(B, SUBLANE)), SUBLANE))
    act_budget = vmem_budget - weight_bytes - (4 << 20)
    while Bt > SUBLANE and Bt * act_row_bytes > act_budget:
        Bt = max(SUBLANE, _round_up(Bt // 2, SUBLANE))
    Bp = _round_up(B, Bt)
    # Guarantee >= 2 grid steps so v7x's second TensorCore gets work.
    if Bp // Bt == 1 and Bt > SUBLANE:
        Bt = max(SUBLANE, _round_up(Bt // 2, SUBLANE))
        Bp = _round_up(B, Bt)
    if Bp != B:
        counts = jnp.pad(counts, ((0, Bp - B), (0, 0)))
    grid = (Bp // Bt,)

    vmem_limit = int(min(max(weight_bytes + Bt * act_row_bytes + (8 << 20),
                             16 << 20), vmem_budget))

    # Scheduling hints.
    flops = 2 * Bp * (Vp * Dp + Dp * Hp + Hp * Dp + Dp * Vp)
    bytes_accessed = int(counts.size) * 4 + weight_bytes + Bp * Vp * out_itemsize

    resident = lambda i: (0, 0)
    in_specs = [
        pl.BlockSpec((Bt, Vp), lambda i: (i, 0)),
        # Constant index_map + single buffer: weights are fetched exactly once
        # and stay VMEM-resident across all batch tiles (no double-buffering).
        pl.BlockSpec((Vp, Dp), resident, pipeline_mode=pl.Buffered(1)),
        pl.BlockSpec((Dp, Hp), resident, pipeline_mode=pl.Buffered(1)),
        pl.BlockSpec((Hp, Dp), resident, pipeline_mode=pl.Buffered(1)),
        pl.BlockSpec((Dp, Vp), resident, pipeline_mode=pl.Buffered(1)),
    ]
    args = [counts, WEt, W0t, W1t, WUt]
    if masked_vocab:
        in_specs.append(pl.BlockSpec((1, Vp), resident,
                                     pipeline_mode=pl.Buffered(1)))
        args.append(vocab_bias)

    out = pl.pallas_call(
        functools.partial(mlp_kernel, masked_vocab=masked_vocab),
        out_shape=jax.ShapeDtypeStruct((Bp, Vp), out_dtype),
        grid_spec=pltpu.PrefetchScalarGridSpec(
            num_scalar_prefetch=0,
            grid=grid,
            in_specs=in_specs,
            out_specs=pl.BlockSpec((Bt, Vp), lambda i: (i, 0)),
        ),
        compiler_params=pltpu.CompilerParams(
            dimension_semantics=("parallel",),   # batch tiles split across TCs (v7x)
            vmem_limit_bytes=vmem_limit),
        cost_estimate=pl.CostEstimate(
            flops=flops, transcendentals=Bp * Vp,
            bytes_accessed=bytes_accessed),
    )(*args)

    # TODO(synk): add a vocab-tiled (chunked WUt + online logsumexp) fallback
    # for vocabularies so wide that the resident WUt exceeds v7x's 64 MiB VMEM.

    if Bp == B and Vp == d_vocab:
        return out
    return out[:B, :d_vocab]


def reference_forward(tokens, W_E, W0, W1, WU):
    emb = jnp.take(W_E.T, tokens, axis=0)          # (B, P, d)
    x = emb.sum(axis=1)                            # (B, d)
    h0 = jax.nn.relu(x @ W0.T)
    h1 = jax.nn.relu(h0 @ W1.T)
    logits = h1 @ WU.T
    return jax.nn.log_softmax(logits, axis=-1)


if __name__ == "__main__":
    d_vocab = 32
    d_model = 32
    B, P = 2, 8

    key = jax.random.PRNGKey(0)
    k_tok, k_e, k_0, k_1, k_u = jax.random.split(key, 5)

    # Deterministic synthetic parameters (shapes match the PyTorch module).
    W_E = jax.random.normal(k_e, (d_model, d_vocab), jnp.float32) / d_model ** 0.5
    W0 = jax.random.normal(k_0, (2 * d_model, d_model), jnp.float32) * (1.0 / d_model ** 0.5)
    W1 = jax.random.normal(k_1, (d_model, 2 * d_model), jnp.float32) * (1.0 / (2 * d_model) ** 0.5)
    WU = jax.random.normal(k_u, (d_vocab, d_model), jnp.float32) * (1.0 / d_model ** 0.5)

    tokens = jax.random.randint(k_tok, (B, P), 0, d_vocab, dtype=jnp.int32)

    # One-time weight prep (transpose + lane padding).  Pass
    # weight_dtype=jnp.bfloat16 (and optionally out_dtype=jnp.bfloat16) for
    # production sizes on v6e/v7x.
    params = prepare_params(W_E, W0, W1, WU, weight_dtype=jnp.float32)

    out = mlp_forward(tokens, params)
    out = jax.block_until_ready(out)

    ref = reference_forward(tokens, W_E, W0, W1, WU)
    assert out.shape == (B, d_vocab)
    assert jnp.allclose(out, ref, atol=1e-4, rtol=1e-4), "mismatch vs JAX reference"

    print("KERNEL_OK")
</pallas_src>

<mosaic_0001>
module attributes {stable_mosaic.version = 11 : i64} {
  func.func @mlp_kernel(%arg0: i32, %arg1: memref<8x128xf32, #tpu.memory_space<vmem>>, %arg2: memref<128x128xf32, #tpu.memory_space<vmem>>, %arg3: memref<128x128xf32, #tpu.memory_space<vmem>>, %arg4: memref<128x128xf32, #tpu.memory_space<vmem>>, %arg5: memref<128x128xf32, #tpu.memory_space<vmem>>, %arg6: memref<1x128xf32, #tpu.memory_space<vmem>>, %arg7: memref<8x128xf32, #tpu.memory_space<vmem>>) attributes {dimension_semantics = [#tpu.dimension_semantics<parallel>], iteration_bounds = array<i64: 1>, scalar_prefetch = 0 : i64, scratch_operands = 0 : i64, tpu.core_type = #tpu.core_type<tc>, window_params = [{transform_indices = @transform_0, window_bounds = array<i64: 8, 128>}, {pipeline_mode = #tpu.pipeline_mode<synchronous>, transform_indices = @transform_1, window_bounds = array<i64: 128, 128>}, {pipeline_mode = #tpu.pipeline_mode<synchronous>, transform_indices = @transform_2, window_bounds = array<i64: 128, 128>}, {pipeline_mode = #tpu.pipeline_mode<synchronous>, transform_indices = @transform_3, window_bounds = array<i64: 128, 128>}, {pipeline_mode = #tpu.pipeline_mode<synchronous>, transform_indices = @transform_4, window_bounds = array<i64: 128, 128>}, {pipeline_mode = #tpu.pipeline_mode<synchronous>, transform_indices = @transform_5, window_bounds = array<i64: 1, 128>}, {transform_indices = @transform_6, window_bounds = array<i64: 8, 128>}]} {
    %c0 = arith.constant 0 : index
    %c0_0 = arith.constant 0 : index
    %0 = vector.load %arg1[%c0, %c0_0] : memref<8x128xf32, #tpu.memory_space<vmem>>, vector<8x128xf32>
    %c0_1 = arith.constant 0 : index
    %c0_2 = arith.constant 0 : index
    %1 = vector.load %arg2[%c0_1, %c0_2] : memref<128x128xf32, #tpu.memory_space<vmem>>, vector<128x128xf32>
    %cst = arith.constant dense<0.000000e+00> : vector<8x128xf32>
    %2 = tpu.matmul %0, %1, %cst {dimension_numbers = #tpu.dot_dimension_numbers<[1], [0], [0], [1], [0, 0, 1, 1], [], []>, precision = #tpu.contract_precision<fp32>} : vector<8x128xf32>, vector<128x128xf32>, vector<8x128xf32> -> vector<8x128xf32>
    %c0_3 = arith.constant 0 : index
    %c0_4 = arith.constant 0 : index
    %3 = vector.load %arg3[%c0_3, %c0_4] : memref<128x128xf32, #tpu.memory_space<vmem>>, vector<128x128xf32>
    %cst_5 = arith.constant dense<0.000000e+00> : vector<8x128xf32>
    %4 = tpu.matmul %2, %3, %cst_5 {dimension_numbers = #tpu.dot_dimension_numbers<[1], [0], [0], [1], [0, 0, 1, 1], [], []>} : vector<8x128xf32>, vector<128x128xf32>, vector<8x128xf32> -> vector<8x128xf32>
    %cst_6 = arith.constant 0.000000e+00 : f32
    %5 = vector.broadcast %cst_6 : f32 to vector<8x128xf32>
    %6 = arith.maximumf %4, %5 : vector<8x128xf32>
    %c0_7 = arith.constant 0 : index
    %c0_8 = arith.constant 0 : index
    %7 = vector.load %arg4[%c0_7, %c0_8] : memref<128x128xf32, #tpu.memory_space<vmem>>, vector<128x128xf32>
    %cst_9 = arith.constant dense<0.000000e+00> : vector<8x128xf32>
    %8 = tpu.matmul %6, %7, %cst_9 {dimension_numbers = #tpu.dot_dimension_numbers<[1], [0], [0], [1], [0, 0, 1, 1], [], []>} : vector<8x128xf32>, vector<128x128xf32>, vector<8x128xf32> -> vector<8x128xf32>
    %cst_10 = arith.constant 0.000000e+00 : f32
    %9 = vector.broadcast %cst_10 : f32 to vector<8x128xf32>
    %10 = arith.maximumf %8, %9 : vector<8x128xf32>
    %c0_11 = arith.constant 0 : index
    %c0_12 = arith.constant 0 : index
    %11 = vector.load %arg5[%c0_11, %c0_12] : memref<128x128xf32, #tpu.memory_space<vmem>>, vector<128x128xf32>
    %cst_13 = arith.constant dense<0.000000e+00> : vector<8x128xf32>
    %12 = tpu.matmul %10, %11, %cst_13 {dimension_numbers = #tpu.dot_dimension_numbers<[1], [0], [0], [1], [0, 0, 1, 1], [], []>} : vector<8x128xf32>, vector<128x128xf32>, vector<8x128xf32> -> vector<8x128xf32>
    %c0_14 = arith.constant 0 : index
    %c0_15 = arith.constant 0 : index
    %13 = vector.load %arg6[%c0_14, %c0_15] : memref<1x128xf32, #tpu.memory_space<vmem>>, vector<1x128xf32>
    %14 = vector.broadcast %13 : vector<1x128xf32> to vector<8x128xf32>
    %15 = arith.addf %12, %14 : vector<8x128xf32>
    %cst_16 = arith.constant dense<0xFF800000> : vector<8xf32>
    %16 = vector.multi_reduction <maximumf>, %15, %cst_16 [1] : vector<8x128xf32> to vector<8xf32>
    %17 = vector.shape_cast %16 : vector<8xf32> to vector<8x1xf32>
    %18 = vector.broadcast %17 : vector<8x1xf32> to vector<8x128xf32>
    %19 = arith.subf %15, %18 : vector<8x128xf32>
    %20 = math.exp %19 : vector<8x128xf32>
    %cst_17 = arith.constant dense<0.000000e+00> : vector<8xf32>
    %21 = vector.multi_reduction <add>, %20, %cst_17 [1] : vector<8x128xf32> to vector<8xf32>
    %22 = vector.shape_cast %21 : vector<8xf32> to vector<8x1xf32>
    %23 = math.log %22 : vector<8x1xf32>
    %24 = vector.broadcast %23 : vector<8x1xf32> to vector<8x128xf32>
    %25 = arith.subf %19, %24 : vector<8x128xf32>
    %c0_18 = arith.constant 0 : index
    %c0_19 = arith.constant 0 : index
    %26 = vector.load %arg7[%c0_18, %c0_19] : memref<8x128xf32, #tpu.memory_space<vmem>>, vector<8x128xf32>
    tpu.vector_store %arg7[%c0_18, %c0_19], %25 {strides = array<i32>} : memref<8x128xf32, #tpu.memory_space<vmem>>, vector<8x128xf32>,
    return
  }
  func.func @transform_0(%arg0: i32) -> (i32, i32) {
    %c0_i32 = arith.constant 0 : i32
    %c0_i32_0 = arith.constant 0 : i32
    return %arg0, %c0_i32 : i32, i32
  }
  func.func @transform_1(%arg0: i32) -> (i32, i32) {
    %c0_i32 = arith.constant 0 : i32
    %c0_i32_0 = arith.constant 0 : i32
    %c0_i32_1 = arith.constant 0 : i32
    return %c0_i32, %c0_i32_0 : i32, i32
  }
  func.func @transform_2(%arg0: i32) -> (i32, i32) {
    %c0_i32 = arith.constant 0 : i32
    %c0_i32_0 = arith.constant 0 : i32
    %c0_i32_1 = arith.constant 0 : i32
    return %c0_i32, %c0_i32_0 : i32, i32
  }
  func.func @transform_3(%arg0: i32) -> (i32, i32) {
    %c0_i32 = arith.constant 0 : i32
    %c0_i32_0 = arith.constant 0 : i32
    %c0_i32_1 = arith.constant 0 : i32
    return %c0_i32, %c0_i32_0 : i32, i32
  }
  func.func @transform_4(%arg0: i32) -> (i32, i32) {
    %c0_i32 = arith.constant 0 : i32
    %c0_i32_0 = arith.constant 0 : i32
    %c0_i32_1 = arith.constant 0 : i32
    return %c0_i32, %c0_i32_0 : i32, i32
  }
  func.func @transform_5(%arg0: i32) -> (i32, i32) {
    %c0_i32 = arith.constant 0 : i32
    %c0_i32_0 = arith.constant 0 : i32
    %c0_i32_1 = arith.constant 0 : i32
    return %c0_i32, %c0_i32_0 : i32, i32
  }
  func.func @transform_6(%arg0: i32) -> (i32, i32) {
    %c0_i32 = arith.constant 0 : i32
    %c0_i32_0 = arith.constant 0 : i32
    return %arg0, %c0_i32 : i32, i32
  }
}

</mosaic_0001>

<bundles_post_ra>
// kernel: tpu_custom_call.1
= control target key start
LH: loop header
LB: loop body
LE: loop exit
PB: predicated region body
PF: predicated region fallthrough
CT: control target
= control target key end

     0   :  { %11 = vsyncpa [#allocation3], 0  ;;  %s2434_s0 = inlined_call_operand.hbm [shape: f32[8,128], index: 0, kind: input, shape index: {}]   ;;  %s2435_s1 = inlined_call_operand.hbm [shape: f32[128,128], index: 1, kind: input, shape index: {}]   ;;  %s2436_s2 = inlined_call_operand.hbm [shape: f32[128,128], index: 2, kind: input, shape index: {}]   ;;  %s2437_s3 = inlined_call_operand.hbm [shape: f32[128,128], index: 3, kind: input, shape index: {}]   ;;  %s2438_s4 = inlined_call_operand.hbm [shape: f32[128,128], index: 4, kind: input, shape index: {}]   ;;  %s2439_s5 = inlined_call_operand.vmem [shape: f32[1,128], index: 5, kind: input, shape index: {}]   ;;  %s2440_s6 = inlined_call_operand.hbm [shape: f32[8,128], index: 6, kind: output, shape index: {}]  }
   0x1   :  { %12 = vsyncpa [#allocation6], 0 }
   0x2   :  { %13 = vsyncpa [#allocation9], 0 }
   0x3   :  { %14 = vsyncpa [#allocation4], 0  ;;  %s1892_s21 = smov [#allocation5]   ;;  %s1752_s25 = scalar_lea.hbm %s2435_s1, 2048 }
   0x4   :  { %s30_s22 = sshll.u32 %s1892_s21, 4  ;;  %p1753_p0 = scmp.ne.s32.totalorder %s2435_s1, %s1752_s25  ;;  %s31_s22 = int_to_ptr.vmem [resolvable:$true] %s30_s22 }
   0x5   :  { %p1756_p1 = scmp.lt.u32.totalorder %s1752_s25, %s2435_s1 }
   0x7   :  { %p1758_p2 = pnand %p1756_p1, %p1753_p0 }
   0x9   :  { %1761 = shalt.err (!%p1758_p2)
}
   0xa   :  { %s1762_s30 = scalar_lea.vmem %s31_s22, 2048  ;;  %p1767_p4 = scmp.lt.s32.totalorder %s31_s22, %s31_s22 }
   0xb   :  { %p1763_p3 = scmp.ne.s32.totalorder %s31_s22, %s1762_s30  ;;  %p1768_p5 = scmp.lt.s32.totalorder %s1762_s30, %s1762_s30 }
   0xd   :  { %p1769_p6 = por %p1768_p5, %p1767_p4 }
   0xf   :  { %p1770_p7 = pnand %p1769_p6, %p1763_p3 }
  0x11   :  { %1773 = shalt.err (!%p1770_p7)
}
  0x12   :  { %s1893_s7 = smov 128   ;;  %s1894_s8 = smov 8  }
  0x13   :  { %36 = dma.hbm_to_vmem [thread:$0]  %s2435_s1, 2048, %s31_s22, [#allocation6], %s1893_s7, %s1893_s7, %s1894_s8  }
  0x14   :  { %s1895_s11 = smov [#allocation8]   ;;  %s1896_s13 = smov [#allocation2]  }
  0x15   :  { %s54_s12 = sshll.u32 %s1895_s11, 4  ;;  %s21_s14 = sshll.u32 %s1896_s13, 4  ;;  %s55_s12 = int_to_ptr.vmem [resolvable:$true] %s54_s12  ;;  %s22_s14 = int_to_ptr.vmem [resolvable:$true] %s21_s14 }
  0x16   :  { %s1774_s17 = scalar_lea.hbm %s2437_s3, 2048 }
  0x17   :  { %p1775_p8 = scmp.ne.s32.totalorder %s2437_s3, %s1774_s17  ;;  %p1778_p9 = scmp.lt.u32.totalorder %s1774_s17, %s2437_s3 }
  0x19   :  { %p1780_p10 = pnand %p1778_p9, %p1775_p8 }
  0x1b   :  { %1783 = shalt.err (!%p1780_p10)
}
  0x1c   :  { %s1784_s1 = scalar_lea.vmem %s55_s12, 2048  ;;  %p1789_p12 = scmp.lt.s32.totalorder %s55_s12, %s55_s12 }
  0x1d   :  { %p1785_p11 = scmp.ne.s32.totalorder %s55_s12, %s1784_s1  ;;  %p1790_p13 = scmp.lt.s32.totalorder %s1784_s1, %s1784_s1 }
  0x1f   :  { %p1791_p0 = por %p1790_p13, %p1789_p12 }
  0x21   :  { %p1792_p1 = pnand %p1791_p0, %p1785_p11 }
  0x23   :  { %1795 = shalt.err (!%p1792_p1)
}
  0x24   :  { %60 = dma.hbm_to_vmem [thread:$0]  %s2437_s3, 2048, %s55_s12, [#allocation9], %s1893_s7, %s1893_s7, %s1894_s8  }
  0x25   :  { %s1796_s26 = scalar_lea.hbm %s2434_s0, 128 }
  0x26   :  { %p1797_p2 = scmp.ne.s32.totalorder %s2434_s0, %s1796_s26  ;;  %p1800_p3 = scmp.lt.u32.totalorder %s1796_s26, %s2434_s0 }
  0x28   :  { %p1802_p4 = pnand %p1800_p3, %p1797_p2 }
  0x2a   :  { %1805 = shalt.err (!%p1802_p4)
}
  0x2b   :  { %s1806_s9 = scalar_lea.vmem %s22_s14, 128  ;;  %p1811_p6 = scmp.lt.s32.totalorder %s22_s14, %s22_s14 }
  0x2c   :  { %p1807_p5 = scmp.ne.s32.totalorder %s22_s14, %s1806_s9  ;;  %p1812_p7 = scmp.lt.s32.totalorder %s1806_s9, %s1806_s9 }
  0x2e   :  { %p1813_p8 = por %p1812_p7, %p1811_p6 }
  0x30   :  { %p1814_p9 = pnand %p1813_p8, %p1807_p5 }
  0x32   :  { %1817 = shalt.err (!%p1814_p9)
}
  0x33   :  { %24 = dma.hbm_to_vmem [thread:$0]  %s2434_s0, 128, %s22_s14, [#allocation3]  }
  0x34   :  { %s1897_s11 = smov [#allocation7]   ;;  %s1898_s13 = smov [#allocation10]  }
  0x35   :  { %s42_s12 = sshll.u32 %s1897_s11, 4  ;;  %s66_s15 = sshll.u32 %s1898_s13, 4  ;;  %s43_s12 = int_to_ptr.vmem [resolvable:$true] %s42_s12  ;;  %s67_s15 = int_to_ptr.vmem [resolvable:$true] %s66_s15 }
  0x36   :  { %s1818_s18 = scalar_lea.hbm %s2436_s2, 2048 }
  0x37   :  { %p1819_p10 = scmp.ne.s32.totalorder %s2436_s2, %s1818_s18  ;;  %p1822_p11 = scmp.lt.u32.totalorder %s1818_s18, %s2436_s2 }
  0x39   :  { %p1824_p12 = pnand %p1822_p11, %p1819_p10 }
  0x3b   :  { %1827 = shalt.err (!%p1824_p12)
}
  0x3c   :  { %s1828_s0 = scalar_lea.vmem %s43_s12, 2048  ;;  %p1833_p0 = scmp.lt.s32.totalorder %s43_s12, %s43_s12 }
  0x3d   :  { %p1829_p13 = scmp.ne.s32.totalorder %s43_s12, %s1828_s0  ;;  %p1834_p1 = scmp.lt.s32.totalorder %s1828_s0, %s1828_s0 }
  0x3f   :  { %p1835_p2 = por %p1834_p1, %p1833_p0 }
  0x41   :  { %p1836_p3 = pnand %p1835_p2, %p1829_p13 }
  0x43   :  { %1839 = shalt.err (!%p1836_p3)
}
  0x44   :  { %48 = dma.hbm_to_vmem [thread:$0]  %s2436_s2, 2048, %s43_s12, [#allocation6], %s1893_s7, %s1893_s7, %s1894_s8  }
  0x45   :  { %s1840_s25 = scalar_lea.hbm %s2438_s4, 2048 }
  0x46   :  { %p1841_p4 = scmp.ne.s32.totalorder %s2438_s4, %s1840_s25  ;;  %p1844_p5 = scmp.lt.u32.totalorder %s1840_s25, %s2438_s4 }
  0x48   :  { %p1846_p6 = pnand %p1844_p5, %p1841_p4 }
  0x4a   :  { %1849 = shalt.err (!%p1846_p6)
}
  0x4b   :  { %s1850_s30 = scalar_lea.vmem %s67_s15, 2048  ;;  %p1855_p8 = scmp.lt.s32.totalorder %s67_s15, %s67_s15 }
  0x4c   :  { %p1851_p7 = scmp.ne.s32.totalorder %s67_s15, %s1850_s30  ;;  %p1856_p9 = scmp.lt.s32.totalorder %s1850_s30, %s1850_s30 }
  0x4e   :  { %p1857_p10 = por %p1856_p9, %p1855_p8 }
  0x50   :  { %p1858_p11 = pnand %p1857_p10, %p1851_p7 }
  0x52   :  { %1861 = shalt.err (!%p1858_p11)
}
  0x53   :  { %72 = dma.hbm_to_vmem [thread:$0]  %s2438_s4, 2048, %s67_s15, [#allocation9], %s1893_s7, %s1893_s7, %s1894_s8  }
  0x54   :  { %1884 = dma.done.wait [#allocation3], 128  }
  0x55   :  { %1885 = vsyncadd [#allocation3], 4294967168 }
  0x56   :  { %1886 = dma.done.wait [#allocation6], 4096  }
  0x57   :  { %1887 = vsyncadd [#allocation6], 4294963200 }
  0x58   :  { %1888 = dma.done.wait [#allocation9], 4096  }
  0x59   :  { %1889 = vsyncadd [#allocation9], 4294963200  ;;  %v1899_v0 = vmov 0.0|0.0   ;;  %vm1900_vm0 = vmmov 0   ;;  %v2442_v1 = vmov 0.0   ;;  %v2016_v2 = vld [vmem:[#allocation5] sm:$0xff] }
  0x5a   :  { %1536 = vmatprep.subr.bf16.mxu0 %v1899_v0  ;;  %1264 = vmatprep.mubr.msk.f32.mxu0 %vm1900_vm0, %v2442_v1  ;;  %v2018_v3 = vld [vmem:[#allocation5 + $0x8] sm:$0xff]  ;;  %v2020_v4 = vld [vmem:[#allocation5 + $0x10] sm:$0xff]  ;;  %v108_v5 = vand.u32 4294901760, %v2016_v2  ;;  %v2024_v7 = vld [vmem:[#allocation5 + $0x18] sm:$0xff]  ;;  %s1902_s8 = smov [#allocation11]  }
  0x5b   :  { %1512 = vmatprep.subr.bf16.mxu1 %v1899_v0  ;;  %1229 = vmatprep.mubr.msk.f32.mxu1 %vm1900_vm0, %v2442_v1  ;;  %v111_v6 = vand.u32 4294901760, %v2018_v3  ;;  %v114_v8 = vand.u32 4294901760, %v2020_v4  ;;  %v2027_v9 = vld [vmem:[#allocation5 + $0x20] sm:$0xff]  ;;  %v2029_v10 = vld [vmem:[#allocation5 + $0x28] sm:$0xff]  ;;  %v117_v11 = vand.u32 4294901760, %v2024_v7  ;;  %v2034_v14 = vld [vmem:[#allocation5 + $0x30] sm:$0xff] }
  0x5c   :  { %v2453_v12 = vand.u32 4294901760, %v2027_v9  ;;  %v2451_v13 = vand.u32 4294901760, %v2029_v10  ;;  %v2036_v15 = vld [vmem:[#allocation5 + $0x38] sm:$0xff]  ;;  %v2041_v16 = vsub.f32 %v2016_v2, %v108_v5  ;;  %v2450_v19 = vand.u32 4294901760, %v2034_v14  ;;  %v2106_v40 = vld [vmem:[#allocation5 + $0x40] sm:$0xff]  ;;  %v2108_v41 = vld [vmem:[#allocation5 + $0x48] sm:$0xff] }
  0x5d   :  { %v2046_v17 = vsub.f32 %v2018_v3, %v111_v6  ;;  %v2051_v18 = vsub.f32 %v2020_v4, %v114_v8  ;;  %v2057_v20 = vsub.f32 %v2024_v7, %v117_v11  ;;  %v2449_v23 = vand.u32 4294901760, %v2036_v15  ;;  %v2110_v45 = vld [vmem:[#allocation5 + $0x50] sm:$0xff]  ;;  %v2115_v48 = vld [vmem:[#allocation5 + $0x58] sm:$0xff]  ;;  %v2117_v49 = vld [vmem:[#allocation5 + $0x60] sm:$0xff]  ;;  %s1032_s3 = sshll.u32 %s1902_s8, 4  ;;  %s1033_s3 = int_to_ptr.vmem [resolvable:$true] %s1032_s3 }
  0x5e   :  { %v2062_v21 = vsub.f32 %v2027_v9, %v2453_v12  ;;  %v2067_v22 = vsub.f32 %v2029_v10, %v2451_v13  ;;  %v201_v24 = vand.u32 4294901760, %v2041_v16  ;;  %v2076_v27 = vsub.f32 %v2034_v14, %v2450_v19  ;;  %v2121_v54 = vld [vmem:[#allocation5 + $0x68] sm:$0xff]  ;;  %v2123_v55 = vld [vmem:[#allocation5 + $0x70] sm:$0xff]  ;;  %p1867_p13 = scmp.lt.s32.totalorder %s1033_s3, %s1033_s3 }
  0x5f   :  { %v208_v25 = vand.u32 4294901760, %v2046_v17  ;;  %v215_v26 = vand.u32 4294901760, %v2051_v18  ;;  %v2458_v28 = vand.u32 4294901760, %v2057_v20  ;;  %v2084_v31 = vsub.f32 %v2036_v15, %v2449_v23 }
  0x60   :  { %v2457_v29 = vand.u32 4294901760, %v2062_v21  ;;  %v2456_v30 = vand.u32 4294901760, %v2067_v22  ;;  %v202_v32 = vsub.f32 %v2041_v16, %v201_v24  ;;  %v2455_v35 = vand.u32 4294901760, %v2076_v27 }
  0x61   :  { %v209_v33 = vsub.f32 %v2046_v17, %v208_v25  ;;  %v216_v34 = vsub.f32 %v2051_v18, %v215_v26  ;;  %v223_v36 = vsub.f32 %v2057_v20, %v2458_v28  ;;  %v2454_v39 = vand.u32 4294901760, %v2084_v31 }
  0x62   :  { %v230_v37 = vsub.f32 %v2062_v21, %v2457_v29  ;;  %v237_v38 = vsub.f32 %v2067_v22, %v2456_v30  ;;  %v203_v42 = vand.u32 4294901760, %v202_v32  ;;  %v244_v47 = vsub.f32 %v2076_v27, %v2455_v35  ;;  %v2141_v32 = vld [vmem:[#allocation5 + $0x78] sm:$0xff] }
  0x63   :  { %v210_v43 = vand.u32 4294901760, %v209_v33  ;;  %v217_v44 = vand.u32 4294901760, %v216_v34  ;;  %v224_v46 = vand.u32 4294901760, %v223_v36  ;;  %v2446_v52 = vand.u32 4294901760, %v2106_v40 }
  0x64   :  { %v231_v51 = vand.u32 4294901760, %v230_v37  ;;  %v2445_v53 = vand.u32 4294901760, %v2108_v41  ;;  %v238_v57 = vand.u32 4294901760, %v237_v38  ;;  %v251_v58 = vsub.f32 %v2084_v31, %v2454_v39 }
  0x65   :  { %v1537_v50 = vpack.c.bf16 %v210_v43, %v203_v42  ;;  %v1540_v56 = vpack.c.bf16 %v224_v46, %v217_v44  ;;  %v2441_v59 = vand.u32 4294901760, %v2110_v45  ;;  %v2132_v60 = vsub.f32 %v2106_v40, %v2446_v52 }
  0x66   :  { %v2137_v61 = vsub.f32 %v2108_v41, %v2445_v53  ;;  %v2444_v62 = vand.u32 4294901760, %v2115_v48  ;;  %v2448_v63 = vand.u32 4294901760, %v2117_v49  ;;  %v245_v33 = vand.u32 4294901760, %v244_v47 }
  0x67   :  { %1538 = vmatpush3.bf16.msra.mxu0 %v1537_v50  ;;  %v2147_v34 = vsub.f32 %v2110_v45, %v2441_v59  ;;  %v2447_v36 = vand.u32 4294901760, %v2121_v54  ;;  %v2452_v37 = vand.u32 4294901760, %v2123_v55  ;;  %v257_v38 = vand.u32 4294901760, %v2132_v60 }
  0x68   :  { %1539 = vmatprep.subr.bf16.mxu0 %v1899_v0  ;;  %v264_v42 = vand.u32 4294901760, %v2137_v61  ;;  %v2156_v43 = vsub.f32 %v2115_v48, %v2444_v62  ;;  %v2161_v44 = vsub.f32 %v2117_v49, %v2448_v63  ;;  %v1543_v46 = vpack.c.bf16 %v238_v57, %v231_v51 }
  0x69   :  { %v271_v47 = vand.u32 4294901760, %v2147_v34  ;;  %v2167_v50 = vsub.f32 %v2121_v54, %v2447_v36  ;;  %v153_v59 = vand.u32 4294901760, %v2141_v32  ;;  %v252_v1 = vand.u32 4294901760, %v251_v58 }
  0x6a   :  { %v258_v62 = vsub.f32 %v2132_v60, %v257_v38  ;;  %v265_v53 = vsub.f32 %v2137_v61, %v264_v42  ;;  %v278_v52 = vand.u32 4294901760, %v2156_v43  ;;  %v285_v51 = vand.u32 4294901760, %v2161_v44 }
  0x6b   :  { %1541 = vmatpush3.bf16.msra.mxu0 %v1540_v56  ;;  %v2178_v57 = vsub.f32 %v2123_v55, %v2452_v37  ;;  %v272_v36 = vsub.f32 %v2147_v34, %v271_v47  ;;  %v292_v58 = vand.u32 4294901760, %v2167_v50  ;;  %v2186_v63 = vsub.f32 %v2141_v32, %v153_v59 }
  0x6c   :  { %1542 = vmatprep.subr.bf16.mxu0 %v1899_v0  ;;  %v279_v56 = vsub.f32 %v2156_v43, %v278_v52  ;;  %v1546_v23 = vpack.c.bf16 %v252_v1, %v245_v33  ;;  %v259_v19 = vand.u32 4294901760, %v258_v62  ;;  %v266_v13 = vand.u32 4294901760, %v265_v53 }
  0x6d   :  { %v286_v37 = vsub.f32 %v2161_v44, %v285_v51  ;;  %v299_v12 = vand.u32 4294901760, %v2178_v57  ;;  %v273_v39 = vand.u32 4294901760, %v272_v36  ;;  %v293_v30 = vsub.f32 %v2167_v50, %v292_v58 }
  0x6e   :  { %v280_v35 = vand.u32 4294901760, %v279_v56  ;;  %v306_v29 = vand.u32 4294901760, %v2186_v63  ;;  %v1549_v28 = vpack.c.bf16 %v266_v13, %v259_v19  ;;  %v2197_v1 = vpack.c.bf16 %v111_v6, %v108_v5 }
  0x6f   :  { %1544 = vmatpush3.bf16.msra.mxu0 %v1543_v46  ;;  %v300_v53 = vsub.f32 %v2178_v57, %v299_v12  ;;  %v287_v33 = vand.u32 4294901760, %v286_v37  ;;  %v294_v36 = vand.u32 4294901760, %v293_v30  ;;  %v2207_v2 = vpack.c.bf16 %v117_v11, %v114_v8 }
  0x70   :  { %1545 = vmatprep.subr.bf16.mxu0 %v1899_v0  ;;  %v1552_v62 = vpack.c.bf16 %v280_v35, %v273_v39  ;;  %v307_v46 = vsub.f32 %v2186_v63, %v306_v29  ;;  %1514 = vmatpush3.bf16.msra.mxu1 %v2197_v1  ;;  %v2213_v3 = vpack.c.bf16 %v208_v25, %v201_v24  ;;  %v2459_v5 = vand.u32 4294901760, %v2057_v20 }
  0x71   :  { %v2460_v13 = vand.u32 4294901760, %v2062_v21  ;;  %v2461_v4 = vand.u32 4294901760, %v2067_v22  ;;  %1515 = vmatprep.subr.bf16.mxu1 %v1899_v0  ;;  %v2462_v7 = vand.u32 4294901760, %v2076_v27  ;;  %v2463_v8 = vand.u32 4294901760, %v2084_v31 }
  0x72   :  { %v2219_v6 = vpack.c.bf16 %v2459_v5, %v215_v26  ;;  %v2236_v24 = vpack.c.bf16 %v278_v52, %v271_v47  ;;  %v2238_v25 = vpack.c.bf16 %v292_v58, %v285_v51  ;;  %v2241_v26 = vpack.c.bf16 %v306_v29, %v299_v12  ;;  %v90_v29 = vld [vmem:[#allocation2] sm:$0xff]  ;;  %v750_v5 = vld [vmem:[#allocation7 + $0x10] sm:$0xff] }
  0x73   :  { %1547 = vmatpush3.bf16.msra.mxu0 %v1546_v23  ;;  %v2225_v19 = vpack.c.bf16 %v2461_v4, %v2460_v13  ;;  %v2232_v11 = vpack.c.bf16 %v2463_v8, %v2462_v7  ;;  %v2234_v23 = vpack.c.bf16 %v264_v42, %v257_v38  ;;  %v301_v30 = vand.u32 4294901760, %v300_v53  ;;  %v751_v13 = vld [vmem:[#allocation7 + $0x18] sm:$0xff] }
  0x74   :  { %1548 = vmatprep.subr.bf16.mxu0 %v1899_v0  ;;  %1517 = vmatpush3.bf16.msra.mxu1 %v2207_v2  ;;  %v308_v35 = vand.u32 4294901760, %v307_v46  ;;  %v2464_v39 = vand.u32 4294901760, %v2027_v9  ;;  %v2465_v37 = vand.u32 4294901760, %v2029_v10  ;;  %v2466_v38 = vand.u32 4294901760, %v2034_v14  ;;  %v755_v4 = vld [vmem:[#allocation7 + $0x38] sm:$0xff] }
  0x75   :  { %1518 = vmatprep.subr.bf16.mxu1 %v1899_v0  ;;  %v2467_v42 = vand.u32 4294901760, %v2036_v15  ;;  %v2262_v9 = vand.u32 4294901760, %v90_v29  ;;  %v1561_v10 = vpack.c.bf16 %v2046_v17, %v2041_v16  ;;  %v2468_v51 = vand.u32 4294901760, %v2106_v40 }
  0x76   :  { %v2249_v52 = vpack.c.bf16 %v2465_v37, %v2464_v39  ;;  %v1558_v12 = vpack.c.bf16 %v308_v35, %v301_v30  ;;  %v2469_v14 = vand.u32 4294901760, %v2108_v41  ;;  %v1564_v15 = vpack.c.bf16 %v2057_v20, %v2051_v18  ;;  %v758_v35 = vld [vmem:[#allocation7 + $0x50] sm:$0xff]  ;;  %v760_v39 = vld [vmem:[#allocation7 + $0x60] sm:$0xff]  ;;  %v761_v37 = vld [vmem:[#allocation7 + $0x68] sm:$0xff] }
  0x77   :  { %1550 = vmatpush3.bf16.msra.mxu0 %v1549_v28  ;;  %v1555_v28 = vpack.c.bf16 %v294_v36, %v287_v33  ;;  %v2258_v47 = vpack.c.bf16 %v2467_v42, %v2466_v38  ;;  %v2470_v58 = vmov 0.0   ;;  %v2471_v16 = vand.u32 4294901760, %v2110_v45  ;;  %v748_v33 = vld [vmem:[#allocation7] sm:$0xff]  ;;  %v749_v36 = vld [vmem:[#allocation7 + $0x8] sm:$0xff] }
  0x78   :  { %1551 = vmatprep.subr.bf16.mxu0 %v1899_v0  ;;  %1520 = vmatpush3.bf16.msra.mxu1 %v2249_v52  ;;  %v2271_v56 = vpack.c.bf16 %v2469_v14, %v2468_v51  ;;  %v2472_v17 = vand.u32 4294901760, %v2115_v48  ;;  %v2289_v41 = vsub.f32 %v90_v29, %v2262_v9  ;;  %v1567_v18 = vpack.c.bf16 %v2067_v22, %v2062_v21  ;;  %v839_v38 = vld [vmem:[#allocation8 + $0x20] sm:$0xff]  ;;  %v840_v42 = vld [vmem:[#allocation8 + $0x28] sm:$0xff] }
  0x79   :  { %1521 = vmatprep.subr.bf16.mxu1 %v1899_v0  ;;  %v2473_v20 = vand.u32 4294901760, %v2117_v49  ;;  %v2474_v45 = vand.u32 4294901760, %v2121_v54  ;;  %v1570_v21 = vpack.c.bf16 %v2084_v31, %v2076_v27  ;;  %v2475_v22 = vand.u32 4294901760, %v2123_v55  ;;  %v752_v55 = vld [vmem:[#allocation7 + $0x20] sm:$0xff] }
  0x7a   :  { %v2285_v40 = vpack.c.bf16 %v2472_v17, %v2471_v16  ;;  %v190_v53 = vand.u32 4294901760, %v2289_v41  ;;  %v1657_v46 = vpack.c.bf16 %v749_v36, %v748_v33  ;;  %v1573_v27 = vpack.c.bf16 %v2137_v61, %v2132_v60  ;;  %v754_v61 = vld [vmem:[#allocation7 + $0x30] sm:$0xff]  ;;  %v843_v14 = vld [vmem:[#allocation8 + $0x40] sm:$0xff]  ;;  %v846_v17 = vld [vmem:[#allocation8 + $0x58] sm:$0xff] }
  0x7b   :  { %1553 = vmatpush3.bf16.msra.mxu0 %v1552_v62  ;;  %v2300_v48 = vpack.c.bf16 %v2474_v45, %v2473_v20  ;;  %v2314_v49 = vpack.c.bf16 %v153_v59, %v2475_v22  ;;  %v1660_v31 = vpack.c.bf16 %v751_v13, %v750_v5  ;;  %v753_v59 = vld [vmem:[#allocation7 + $0x28] sm:$0xff]  ;;  %v1576_v32 = vpack.c.bf16 %v2156_v43, %v2147_v34  ;;  %v845_v16 = vld [vmem:[#allocation8 + $0x50] sm:$0xff]  ;;  %v850_v45 = vld [vmem:[#allocation8 + $0x78] sm:$0xff] }
  0x7c   :  { %1554 = vmatprep.subr.bf16.mxu0 %v1899_v0  ;;  %1523 = vmatpush3.bf16.msra.mxu1 %v2258_v47  ;;  %v191_v62 = vsub.f32 %v2289_v41, %v190_v53  ;;  %v1663_v60 = vpack.c.bf16 %v753_v59, %v752_v55  ;;  %v1579_v7 = vpack.c.bf16 %v2167_v50, %v2161_v44  ;;  %v757_v34 = vld [vmem:[#allocation7 + $0x48] sm:$0xff]  ;;  %v759_v44 = vld [vmem:[#allocation7 + $0x58] sm:$0xff]  ;;  %v849_v20 = vld [vmem:[#allocation8 + $0x70] sm:$0xff] }
  0x7d   :  { %1524 = vmatprep.subr.bf16.mxu1 %v1899_v0  ;;  %v1666_v8 = vpack.c.bf16 %v755_v4, %v754_v61  ;;  %v1582_v43 = vpack.c.bf16 %v2186_v63, %v2178_v57  ;;  %v1672_v50 = vpack.c.bf16 %v759_v44, %v758_v35  ;;  %v1675_v63 = vpack.c.bf16 %v761_v37, %v760_v39  ;;  %v762_v57 = vld [vmem:[#allocation7 + $0x70] sm:$0xff]  ;;  %v923_v33 = vld [vmem:[#allocation10 + $0x8] sm:$0xff]  ;;  %v926_v13 = vld [vmem:[#allocation10 + $0x20] sm:$0xff] }
  0x7e   :  { %v192_v54 = vand.u32 4294901760, %v191_v62  ;;  %v922_v62 = vld [vmem:[#allocation10] sm:$0xff]  ;;  %v928_v55 = vld [vmem:[#allocation10 + $0x30] sm:$0xff]  ;;  %v929_v59 = vld [vmem:[#allocation10 + $0x38] sm:$0xff] }
  0x7f   :  { %1556 = vmatpush3.bf16.msra.mxu0 %v1555_v28  ;;  %v756_v28 = vld [vmem:[#allocation7 + $0x40] sm:$0xff]  ;;  %v931_v61 = vld [vmem:[#allocation10 + $0x48] sm:$0xff]  ;;  %v937_v35 = vld [vmem:[#allocation10 + $0x78] sm:$0xff] }
  0x80   :  { %1557 = vmatprep.subr.bf16.mxu0 %v1899_v0  ;;  %1526 = vmatpush3.bf16.msra.mxu1 %v2271_v56  ;;  %v1669_v30 = vpack.c.bf16 %v757_v34, %v756_v28  ;;  %v934_v28 = vld [vmem:[#allocation10 + $0x60] sm:$0xff]  ;;  %v935_v34 = vld [vmem:[#allocation10 + $0x68] sm:$0xff] }
  0x81   :  { %1527 = vmatprep.subr.bf16.mxu1 %v1899_v0 }
  0x83   :  { %1559 = vmatpush3.bf16.msra.mxu0 %v1558_v12  ;;  %v838_v12 = vld [vmem:[#allocation8 + $0x18] sm:$0xff] }
  0x84   :  { %1560 = vmatprep.subr.bf16.mxu0 %v1899_v0  ;;  %1529 = vmatpush3.bf16.msra.mxu1 %v2285_v40 }
  0x85   :  { %1530 = vmatprep.subr.bf16.mxu1 %v1899_v0 }
  0x86   :  { %1265 = vmatmul.mubr.f32.vlgmr.msra.gmra.mrb[0].mxu0 %v2262_v9 }
  0x87   :  { %1562 = vmatpush3.bf16.msra.mxu0 %v1561_v10  ;;  %1299 = vmatprep.mubr.msk.f32.mxu0 %vm1900_vm0, %v2470_v58  ;;  %v842_v10 = vld [vmem:[#allocation8 + $0x38] sm:$0xff] }
  0x88   :  { %1563 = vmatprep.subr.bf16.mxu0 %v1899_v0  ;;  %1532 = vmatpush3.bf16.msra.mxu1 %v2300_v48 }
  0x89   :  { %1533 = vmatprep.subr.bf16.mxu1 %v1899_v0 }
  0x8b   :  { %1565 = vmatpush3.bf16.msra.mxu0 %v1564_v15 }
  0x8c   :  { %1566 = vmatprep.subr.bf16.mxu0 %v1899_v0  ;;  %1535 = vmatpush3.bf16.msra.mxu1 %v2314_v49 }
  0x8d   :  { %1656 = vmatprep.subr.bf16.mxu1 %v1899_v0 }
  0x8f   :  { %1568 = vmatpush3.bf16.msra.mxu0 %v1567_v18  ;;  %1230 = vmatmul.mubr.f32.vlgmr.msra.gmra.mrb[0].mxu1 %v192_v54  ;;  %v924_v54 = vld [vmem:[#allocation10 + $0x10] sm:$0xff] }
  0x90   :  { %1569 = vmatprep.subr.bf16.mxu0 %v1899_v0  ;;  %1658 = vmatpush3.bf16.msra.mxu1 %v1657_v46  ;;  %v925_v46 = vld [vmem:[#allocation10 + $0x18] sm:$0xff] }
  0x91   :  { %1439 = vmatprep.mubr.msk.f32.mxu1 %vm1900_vm0, %v2470_v58  ;;  %1659 = vmatprep.subr.bf16.mxu1 %v1899_v0  ;;  %v1708_v5 = vpack.c.bf16 %v925_v46, %v924_v54 }
  0x93   :  { %1571 = vmatpush3.bf16.msra.mxu0 %v1570_v21  ;;  %v1705_v21 = vpack.c.bf16 %v923_v33, %v922_v62 }
  0x94   :  { %1572 = vmatprep.subr.bf16.mxu0 %v1899_v0  ;;  %1661 = vmatpush3.bf16.msra.mxu1 %v1660_v31 }
  0x95   :  { %1662 = vmatprep.subr.bf16.mxu1 %v1899_v0 }
  0x97   :  { %1574 = vmatpush3.bf16.msra.mxu0 %v1573_v27  ;;  %v927_v27 = vld [vmem:[#allocation10 + $0x28] sm:$0xff] }
  0x98   :  { %1575 = vmatprep.subr.bf16.mxu0 %v1899_v0  ;;  %1664 = vmatpush3.bf16.msra.mxu1 %v1663_v60  ;;  %v1711_v31 = vpack.c.bf16 %v927_v27, %v926_v13  ;;  %v930_v60 = vld [vmem:[#allocation10 + $0x40] sm:$0xff] }
  0x99   :  { %1665 = vmatprep.subr.bf16.mxu1 %v1899_v0  ;;  %v1717_v4 = vpack.c.bf16 %v931_v61, %v930_v60 }
  0x9b   :  { %1577 = vmatpush3.bf16.msra.mxu0 %v1576_v32  ;;  %v1714_v32 = vpack.c.bf16 %v929_v59, %v928_v55 }
  0x9c   :  { %1578 = vmatprep.subr.bf16.mxu0 %v1899_v0  ;;  %1667 = vmatpush3.bf16.msra.mxu1 %v1666_v8 }
  0x9d   :  { %1668 = vmatprep.subr.bf16.mxu1 %v1899_v0 }
  0x9f   :  { %1580 = vmatpush3.bf16.msra.mxu0 %v1579_v7  ;;  %v933_v7 = vld [vmem:[#allocation10 + $0x58] sm:$0xff] }
  0xa0   :  { %1581 = vmatprep.subr.bf16.mxu0 %v1899_v0  ;;  %1670 = vmatpush3.bf16.msra.mxu1 %v1669_v30  ;;  %v936_v30 = vld [vmem:[#allocation10 + $0x70] sm:$0xff] }
  0xa1   :  { %1671 = vmatprep.subr.bf16.mxu1 %v1899_v0  ;;  %v1726_v44 = vpack.c.bf16 %v937_v35, %v936_v30 }
  0xa3   :  { %1583 = vmatpush3.bf16.msra.mxu0 %v1582_v43  ;;  %v1723_v43 = vpack.c.bf16 %v935_v34, %v934_v28 }
  0xa4   :  { %1584 = vmatprep.subr.bf16.mxu0 %v1899_v0  ;;  %1673 = vmatpush3.bf16.msra.mxu1 %v1672_v50 }
  0xa5   :  { %1674 = vmatprep.subr.bf16.mxu1 %v1899_v0 }
  0xa6   :  { %1300 = vmatmul.mubr.f32.vlgmr.msra.gmra.mrb[0].mxu0 %v2289_v41  ;;  %v847_v41 = vld [vmem:[#allocation8 + $0x60] sm:$0xff] }
  0xa7   :  { %1586 = vmatpush3.bf16.msra.mxu0 %v2197_v1  ;;  %1334 = vmatprep.mubr.msk.f32.mxu0 %vm1900_vm0, %v2470_v58 }
  0xa8   :  { %1587 = vmatprep.subr.bf16.mxu0 %v1899_v0  ;;  %1676 = vmatpush3.bf16.msra.mxu1 %v1675_v63  ;;  %v1043_v63 = vld [vmem:[%s2439_s5] ss:$0 sm:$0xff]  ;;  %s1862_s5 = scalar_lea.vmem %s1033_s3, 128 }
  0xa9   :  { %1677 = vmatprep.subr.bf16.mxu1 %v1899_v0  ;;  %p1863_p12 = scmp.ne.s32.totalorder %s1033_s3, %s1862_s5  ;;  %p1868_p0 = scmp.lt.s32.totalorder %s1862_s5, %s1862_s5 }
  0xab   :  { %1589 = vmatpush3.bf16.msra.mxu0 %v2207_v2  ;;  %p1869_p1 = por %p1868_p0, %p1867_p13 }
  0xac   :  { %1590 = vmatprep.subr.bf16.mxu0 %v1899_v0 }
  0xad   :  { %p1870_p2 = pnand %p1869_p1, %p1863_p12 }
  0xaf   :  { %1592 = vmatpush3.bf16.msra.mxu0 %v2249_v52 }
  0xb0   :  { %1593 = vmatprep.subr.bf16.mxu0 %v1899_v0 }
  0xb3   :  { %1595 = vmatpush3.bf16.msra.mxu0 %v2258_v47 }
  0xb4   :  { %1596 = vmatprep.subr.bf16.mxu0 %v1899_v0 }
  0xb7   :  { %1598 = vmatpush3.bf16.msra.mxu0 %v2271_v56 }
  0xb8   :  { %1599 = vmatprep.subr.bf16.mxu0 %v1899_v0 }
  0xbb   :  { %1601 = vmatpush3.bf16.msra.mxu0 %v2285_v40 }
  0xbc   :  { %1602 = vmatprep.subr.bf16.mxu0 %v1899_v0 }
  0xbf   :  { %1604 = vmatpush3.bf16.msra.mxu0 %v2300_v48 }
  0xc0   :  { %1605 = vmatprep.subr.bf16.mxu0 %v1899_v0 }
  0xc3   :  { %1607 = vmatpush3.bf16.msra.mxu0 %v2314_v49 }
  0xc4   :  { %1608 = vmatprep.subr.bf16.mxu0 %v1899_v0 }
  0xc6   :  { %1335 = vmatmul.mubr.f32.vlgmr.msra.gmra.mrb[0].mxu0 %v190_v53  ;;  %v848_v53 = vld [vmem:[#allocation8 + $0x68] sm:$0xff] }
  0xc7   :  { %1610 = vmatpush3.bf16.msra.mxu0 %v2213_v3  ;;  %1369 = vmatprep.mubr.msk.f32.mxu0 %vm1900_vm0, %v2470_v58  ;;  %v1699_v18 = vpack.c.bf16 %v848_v53, %v847_v41 }
  0xc8   :  { %1611 = vmatprep.subr.bf16.mxu0 %v1899_v0 }
  0xcb   :  { %1613 = vmatpush3.bf16.msra.mxu0 %v2219_v6 }
  0xcc   :  { %1614 = vmatprep.subr.bf16.mxu0 %v1899_v0 }
  0xcf   :  { %1616 = vmatpush3.bf16.msra.mxu0 %v2225_v19  ;;  %v835_v19 = vld [vmem:[#allocation8] sm:$0xff] }
  0xd0   :  { %1617 = vmatprep.subr.bf16.mxu0 %v1899_v0 }
  0xd3   :  { %1619 = vmatpush3.bf16.msra.mxu0 %v2232_v11  ;;  %v836_v11 = vld [vmem:[#allocation8 + $0x8] sm:$0xff] }
  0xd4   :  { %1620 = vmatprep.subr.bf16.mxu0 %v1899_v0 }
  0xd7   :  { %1622 = vmatpush3.bf16.msra.mxu0 %v2234_v23 }
  0xd8   :  { %1623 = vmatprep.subr.bf16.mxu0 %v1899_v0 }
  0xdb   :  { %1625 = vmatpush3.bf16.msra.mxu0 %v2236_v24  ;;  %v1681_v24 = vpack.c.bf16 %v836_v11, %v835_v19 }
  0xdc   :  { %1626 = vmatprep.subr.bf16.mxu0 %v1899_v0 }
  0xdf   :  { %1628 = vmatpush3.bf16.msra.mxu0 %v2238_v25 }
  0xe0   :  { %1629 = vmatprep.subr.bf16.mxu0 %v1899_v0 }
  0xe3   :  { %1631 = vmatpush3.bf16.msra.mxu0 %v2241_v26 }
  0xe4   :  { %1632 = vmatprep.subr.bf16.mxu0 %v1899_v0 }
  0xe6   :  { %1370 = vmatmul.mubr.f32.vlgmr.msra.gmra.mrb[0].mxu0 %v2262_v9 }
  0xe7   :  { %1634 = vmatpush3.bf16.msra.mxu0 %v2197_v1  ;;  %1404 = vmatprep.mubr.msk.f32.mxu0 %vm1900_vm0, %v2470_v58  ;;  %v763_v1 = vld [vmem:[#allocation7 + $0x78] sm:$0xff] }
  0xe8   :  { %1635 = vmatprep.subr.bf16.mxu0 %v1899_v0 }
  0xeb   :  { %1637 = vmatpush3.bf16.msra.mxu0 %v2207_v2  ;;  %v1678_v2 = vpack.c.bf16 %v763_v1, %v762_v57 }
  0xec   :  { %1638 = vmatprep.subr.bf16.mxu0 %v1899_v0 }
  0xed   :  { %1679 = vmatpush3.bf16.msra.mxu1 %v1678_v2 }
  0xee   :  { %1680 = vmatprep.subr.bf16.mxu1 %v1899_v0 }
  0xef   :  { %1640 = vmatpush3.bf16.msra.mxu0 %v2249_v52  ;;  %v837_v52 = vld [vmem:[#allocation8 + $0x10] sm:$0xff] }
  0xf0   :  { %1641 = vmatprep.subr.bf16.mxu0 %v1899_v0  ;;  %v1684_v29 = vpack.c.bf16 %v838_v12, %v837_v52 }
  0xf3   :  { %1643 = vmatpush3.bf16.msra.mxu0 %v2258_v47  ;;  %v1687_v47 = vpack.c.bf16 %v840_v42, %v839_v38 }
  0xf4   :  { %1644 = vmatprep.subr.bf16.mxu0 %v1899_v0 }
  0xf7   :  { %1646 = vmatpush3.bf16.msra.mxu0 %v2271_v56  ;;  %v844_v56 = vld [vmem:[#allocation8 + $0x48] sm:$0xff] }
  0xf8   :  { %1647 = vmatprep.subr.bf16.mxu0 %v1899_v0  ;;  %v1693_v15 = vpack.c.bf16 %v844_v56, %v843_v14 }
  0xfb   :  { %1649 = vmatpush3.bf16.msra.mxu0 %v2285_v40  ;;  %v1696_v40 = vpack.c.bf16 %v846_v17, %v845_v16 }
  0xfc   :  { %1650 = vmatprep.subr.bf16.mxu0 %v1899_v0 }
  0xff   :  { %1652 = vmatpush3.bf16.msra.mxu0 %v2300_v48  ;;  %v1702_v48 = vpack.c.bf16 %v850_v45, %v849_v20 }
 0x100   :  { %1653 = vmatprep.subr.bf16.mxu0 %v1899_v0 }
 0x103   :  { %1655 = vmatpush3.bf16.msra.mxu0 %v2314_v49 }
 0x106   :  { %1405 = vmatmul.mubr.f32.vlgmr.msra.gmra.mrb[0].mxu0 %v2262_v9  ;;  %v841_v9 = vld [vmem:[#allocation8 + $0x30] sm:$0xff] }
 0x107   :  { %v1690_v51 = vpack.c.bf16 %v842_v10, %v841_v9 }
 0x162   :  { %v194_v3 = vpop.f32.mrb[0].mxu1 }
 0x163   :  { %v1231_v6 = vpop.f32.mrb[1].mxu1 }
 0x1d9   :  { %v744_v23 = vpop.f32.mrb[0].mxu0 }
 0x1da   :  { %v1728_v25 = vadd.f32 %v744_v23, %v194_v3  ;;  %v1406_v26 = vpop.f32.mrb[1].mxu0 }
 0x1dc   :  { %1440 = vmatmul.mubr.f32.vlgmr.msra.gmra.mrb[2].mxu1 %v1728_v25 }
 0x1dd   :  { %1682 = vmatpush3.bf16.msra.mxu1 %v1681_v24  ;;  %1474 = vmatprep.mubr.msk.f32.mxu1 %vm1900_vm0, %v2470_v58 }
 0x1de   :  { %1683 = vmatprep.subr.bf16.mxu1 %v1899_v0 }
 0x1e1   :  { %1685 = vmatpush3.bf16.msra.mxu1 %v1684_v29 }
 0x1e2   :  { %1686 = vmatprep.subr.bf16.mxu1 %v1899_v0 }
 0x1e5   :  { %1688 = vmatpush3.bf16.msra.mxu1 %v1687_v47 }
 0x1e6   :  { %1689 = vmatprep.subr.bf16.mxu1 %v1899_v0 }
 0x1e9   :  { %1691 = vmatpush3.bf16.msra.mxu1 %v1690_v51 }
 0x1ea   :  { %1692 = vmatprep.subr.bf16.mxu1 %v1899_v0 }
 0x1ed   :  { %1694 = vmatpush3.bf16.msra.mxu1 %v1693_v15 }
 0x1ee   :  { %1695 = vmatprep.subr.bf16.mxu1 %v1899_v0 }
 0x1f1   :  { %1697 = vmatpush3.bf16.msra.mxu1 %v1696_v40 }
 0x1f2   :  { %1698 = vmatprep.subr.bf16.mxu1 %v1899_v0 }
 0x1f5   :  { %1700 = vmatpush3.bf16.msra.mxu1 %v1699_v18 }
 0x1f6   :  { %1701 = vmatprep.subr.bf16.mxu1 %v1899_v0 }
 0x1f9   :  { %1703 = vmatpush3.bf16.msra.mxu1 %v1702_v48 }
 0x1fa   :  { %1704 = vmatprep.subr.bf16.mxu1 %v1899_v0 }
 0x2af   :  { %v830_v36 = vpop.f32.mrb[2].mxu1 }
 0x2b0   :  { %v834_v22 = vmax.f32 %v830_v36, 0.0  ;;  %v1441_v49 = vpop.f32.mrb[3].mxu1 }
 0x2b2   :  { %1475 = vmatmul.mubr.f32.vlgmr.msra.gmra.mrb[4].mxu1 %v834_v22 }
 0x2b3   :  { %1706 = vmatpush3.bf16.msra.mxu1 %v1705_v21  ;;  %1509 = vmatprep.mubr.msk.f32.mxu1 %vm1900_vm0, %v2470_v58  ;;  %v932_v58 = vld [vmem:[#allocation10 + $0x50] sm:$0xff] }
 0x2b4   :  { %1707 = vmatprep.subr.bf16.mxu1 %v1899_v0  ;;  %v1720_v8 = vpack.c.bf16 %v933_v7, %v932_v58 }
 0x2b7   :  { %1709 = vmatpush3.bf16.msra.mxu1 %v1708_v5 }
 0x2b8   :  { %1710 = vmatprep.subr.bf16.mxu1 %v1899_v0 }
 0x2bb   :  { %1712 = vmatpush3.bf16.msra.mxu1 %v1711_v31 }
 0x2bc   :  { %1713 = vmatprep.subr.bf16.mxu1 %v1899_v0 }
 0x2bf   :  { %1715 = vmatpush3.bf16.msra.mxu1 %v1714_v32 }
 0x2c0   :  { %1716 = vmatprep.subr.bf16.mxu1 %v1899_v0 }
 0x2c3   :  { %1718 = vmatpush3.bf16.msra.mxu1 %v1717_v4 }
 0x2c4   :  { %1719 = vmatprep.subr.bf16.mxu1 %v1899_v0 }
 0x2c7   :  { %1721 = vmatpush3.bf16.msra.mxu1 %v1720_v8 }
 0x2c8   :  { %1722 = vmatprep.subr.bf16.mxu1 %v1899_v0 }
 0x2cb   :  { %1724 = vmatpush3.bf16.msra.mxu1 %v1723_v43 }
 0x2cc   :  { %1725 = vmatprep.subr.bf16.mxu1 %v1899_v0 }
 0x2cf   :  { %1727 = vmatpush3.bf16.msra.mxu1 %v1726_v44 }
 0x385   :  { %v917_v50 = vpop.f32.mrb[4].mxu1 }
 0x386   :  { %v921_v39 = vmax.f32 %v917_v50, 0.0  ;;  %v1476_v37 = vpop.f32.mrb[5].mxu1 }
 0x388   :  { %1510 = vmatmul.mubr.f32.vlgmr.msra.gmra.mrb[6].mxu1 %v921_v39 }
 0x45b   :  { %v1011_v57 = vpop.f32.mrb[6].mxu1 }
 0x45c   :  { %v1012_v1 = vadd.f32 %v1043_v63, %v1011_v57  ;;  %v1511_v2 = vpop.f32.mrb[7].mxu1 }
 0x45e   :  { %1015 = vmax.xlane.f32.xlu0 %v1012_v1 }
 0x4eb   :  { %v1016_v3 = vpop.xlane.xlu0 %1015 }
 0x4ec   :  { %v1017_v6 = vsub.f32 %v1012_v1, %v1016_v3 }
 0x4ee   :  { %v1018_v19 = vmul.f32 1.442695, %v1017_v6 }
 0x4f0   :  { %1748 = vpow2.f32 %v1018_v19 }
 0x4fa   :  { %v1749_v0 = vpop.eup %1748 }
 0x4fb   :  { %1020 = vadd.xlane.f32.xlu0 %v1749_v0 }
 0x588   :  { %v1021_v11 = vpop.xlane.xlu0 %1020 }
 0x589   :  { %1750 = vlog2.f32 %v1021_v11 }
 0x593   :  { %v1751_v23 = vpop.eup %1750 }
 0x594   :  { %v1023_v24 = vmul.f32 0.6931472, %v1751_v23 }
 0x596   :  { %v1024_v25 = vsub.f32 %v1017_v6, %v1023_v24 }
 0x598   :  { %1025 = vst [vmem:[#allocation11] sm:$0xff] %v1024_v25 }
 0x599   :  { %1873 = shalt.err (!%p1870_p2)
}
 0x59a   :  { %s1874_s12 = scalar_lea.hbm %s2440_s6, 128 }
 0x59b   :  { %p1875_p3 = scmp.ne.s32.totalorder %s2440_s6, %s1874_s12  ;;  %p1878_p4 = scmp.lt.u32.totalorder %s1874_s12, %s2440_s6 }
 0x59d   :  { %p1880_p5 = pnand %p1878_p4, %p1875_p3 }
 0x59f   :  { %1883 = shalt.err (!%p1880_p5)
}
 0x5a0   :  { %1035 = dma.vmem_to_hbm [thread:$0]  %s1033_s3, 128, %s2440_s6, [#allocation4]  }
 0x5a1   :  { %1890 = dma.done.wait [#allocation4], 128  }
 0x5a2   :  { %1891 = vsyncadd [#allocation4], 4294967168 }
 0x5a3   :  { %1039 = vsyncpa [#allocation3], 1 }
 0x5a4   :  { %1040 = vsyncpa [#allocation6], 1 }
 0x5a5   :  { %1041 = vsyncpa [#allocation9], 1 }
 0x5a6   :  { %1042 = vsyncpa [#allocation4], 1 }

</bundles_post_ra>
